<compile_context>
chip_gen: v5e
topology: v5e:2x2
jax: 0.10.0
libtpu: 0.0.40
codegen_flags: <defaults>
</compile_context>

<pallas_src>
import jax
import jax.numpy as jnp
from jax.experimental import pallas as pl
from jax.experimental.pallas import tpu as pltpu


def _identity_kernel(x_ref, o_ref):
    # Pure elementwise pass-through on the full VMEM-resident block (VPU path).
    o_ref[...] = x_ref[...]


def _lane_dense_shape(total_elems, fallback_shape):
    """Pick a 2-D slab whose last (lane) axis is a multiple of 128 if possible."""
    if total_elems % 128 == 0:
        return (total_elems // 128, 128)
    return fallback_shape


def pixelcnn_forward(x_nchw):
    """Mirrors PixelCNN.forward(x).

    The reference forward body is `pass` (returns None); we run the identity
    Pallas kernel over x for the runnable check and return (None, y) where
    `None` is the faithful module output and `y` is the kernel result.
    """
    n, c, h, w = x_nchw.shape
    total = n * c * h * w
    # Lane-dense slab: (16, 128) for the (2,4,16,16) example.  Rows are a
    # multiple of 8 (sublane) and the last dim a multiple of 128 (lane), so
    # stores are full-width unmasked vst.
    slab_shape = _lane_dense_shape(total, (n * c * h, w))
    x2d = x_nchw.reshape(slab_shape)

    nbytes = x2d.size * x2d.dtype.itemsize

    y2d = pl.pallas_call(
        _identity_kernel,
        out_shape=jax.ShapeDtypeStruct(x2d.shape, x2d.dtype),
        # Gridless, full-block VMEM specs: minimal-overhead form for an 8 KiB
        # identity (no per-step pipeline bookkeeping).
        in_specs=[pl.BlockSpec(memory_space=pltpu.MemorySpace.VMEM)],
        out_specs=pl.BlockSpec(memory_space=pltpu.MemorySpace.VMEM),
        # Identity: alias the input buffer to the output to drop the extra
        # HBM output allocation / writeback.
        input_output_aliases={0: 0},
        cost_estimate=pl.CostEstimate(
            flops=0, transcendentals=0, bytes_accessed=2 * nbytes
        ),
    )(x2d)

    y = y2d.reshape(n, c, h, w)
    # Faithful module output is None (forward body is `pass`).
    return None, y


if __name__ == "__main__":
    key = jax.random.PRNGKey(0)
    x = jax.random.normal(key, (2, 4, 16, 16), dtype=jnp.float32)  # NCHW

    module_out, kernel_out = pixelcnn_forward(x)
    jax.block_until_ready(kernel_out)

    # Sanity: kernel is an exact identity over the input.
    assert module_out is None
    assert kernel_out.shape == x.shape
    assert bool(jnp.all(kernel_out == x))

    print("KERNEL_OK")
</pallas_src>

<mosaic_0001>
module attributes {stable_mosaic.version = 11 : i64} {
  func.func @_identity_kernel(%arg0: memref<16x128xf32, #tpu.memory_space<vmem>>, %arg1: memref<16x128xf32, #tpu.memory_space<vmem>>) attributes {dimension_semantics = [], scalar_prefetch = 0 : i64, scratch_operands = 0 : i64, tpu.core_type = #tpu.core_type<tc>} {
    %c0 = arith.constant 0 : index
    %c0_0 = arith.constant 0 : index
    %0 = vector.load %arg0[%c0, %c0_0] : memref<16x128xf32, #tpu.memory_space<vmem>>, vector<16x128xf32>
    %c0_1 = arith.constant 0 : index
    %c0_2 = arith.constant 0 : index
    %1 = vector.load %arg1[%c0_1, %c0_2] : memref<16x128xf32, #tpu.memory_space<vmem>>, vector<16x128xf32>
    tpu.vector_store %arg1[%c0_1, %c0_2], %0 {strides = array<i32>} : memref<16x128xf32, #tpu.memory_space<vmem>>, vector<16x128xf32>,
    return
  }
}

</mosaic_0001>

<bundles_post_ra>
// kernel: tpu_custom_call.1
= control target key start
LH: loop header
LB: loop body
LE: loop exit
PB: predicated region body
PF: predicated region fallthrough
CT: control target
= control target key end

     0   :  { %6 = vsyncpa [#allocation3], 0  ;;  %s124_s0 = inlined_call_operand.hbm [shape: f32[16,128], index: 0, kind: input, shape index: {}, may-alias: {0,1}]   ;;  %s125_s1 = inlined_call_operand.hbm [shape: f32[16,128], index: 1, kind: output, shape index: {}, may-alias: {0,1}]  }
   0x1   :  { %7 = vsyncpa [#allocation4], 0  ;;  %s12_s8 = sshll.u32 %s124_s0, 4  ;;  %s104_s9 = smov [#allocation2]   ;;  %s13_s8 = int_to_ptr.hbm [resolvable:$true] %s12_s8 }
   0x2   :  { %s14_s10 = sshll.u32 %s104_s9, 4  ;;  %s105_s11 = smov 128   ;;  %s15_s10 = int_to_ptr.vmem [resolvable:$true] %s14_s10 }
   0x3   :  { %s106_s12 = smov 8  }
   0x4   :  { %20 = dma.hbm_to_vmem [thread:$0]  %s13_s8, 256, %s15_s10, [#allocation3], %s105_s11, %s105_s11, %s106_s12  }
   0x5   :  { %100 = dma.done.wait [#allocation3], 256  }
   0x6   :  { %101 = vsyncadd [#allocation3], 4294967040  ;;  %s107_s13 = smov [#allocation5]   ;;  %s35_s17 = sshll.u32 %s125_s1, 4  ;;  %v25_v0 = vld [vmem:[#allocation2] sm:$0xff]  ;;  %v26_v1 = vld [vmem:[#allocation2 + $0x8] sm:$0xff]  ;;  %s36_s17 = int_to_ptr.hbm [resolvable:$true] %s35_s17 }
   0x7   :  { %s33_s14 = sshll.u32 %s107_s13, 4  ;;  %27 = vst [vmem:[#allocation5] sm:$0xff] %v25_v0  ;;  %s34_s14 = int_to_ptr.vmem [resolvable:$true] %s33_s14 }
   0x8   :  { %28 = vst [vmem:[#allocation5 + $0x8] sm:$0xff] %v26_v1 }
   0x9   :  { %41 = dma.vmem_to_hbm [thread:$0]  %s34_s14, 256, %s36_s17, [#allocation4], %s105_s11, %s105_s11, %s106_s12  }
   0xa   :  { %102 = dma.done.wait [#allocation4], 256  }
   0xb   :  { %103 = vsyncadd [#allocation4], 4294967040 }
   0xc   :  { %46 = vsyncpa [#allocation3], 1 }
   0xd   :  { %47 = vsyncpa [#allocation4], 1 }

</bundles_post_ra>
